<compile_context>
chip_gen: v5e
topology: v5e:2x2
jax: 0.10.0
libtpu: 0.0.40
codegen_flags: <defaults>
</compile_context>

<pallas_src>
import jax
import jax.numpy as jnp
import numpy as np
from jax.experimental import pallas as pl
from jax.experimental.pallas import tpu as pltpu


def _lowpass_kernel(x_ref, acat_ref, bcat_ref, o_ref):
    # x_ref block : (1, 3*H, W)  float32  (channels pre-stacked along rows)
    # acat_ref    : (4r, H)      float32  [Ar ; Ai]
    # bcat_ref    : (W, 2r)      float32  [Br | Bi]
    # o_ref block : (1, 3, 2r, 2r) float32, last dim = [real | imag]
    a_cat = acat_ref[...]
    b_cat = bcat_ref[...]
    H = a_cat.shape[1]
    two_r = b_cat.shape[1]
    r = two_r // 2
    n_ch = o_ref.shape[1]            # 3 (module hard-codes 3 channels)

    x2d = x_ref[0]                   # (3H, W)

    # Stage 1: single fat matmul, contracts the long W axis for all channels
    # and both re/im column-DFT matrices at once.
    y_all = jnp.dot(x2d, b_cat, preferred_element_type=jnp.float32)     # (3H, 2r)

    # Stage 2: per channel, one fused matmul + VPU combine (static unroll of 3).
    for c in range(n_ch):
        y_c = y_all[c * H:(c + 1) * H]                                   # (H, 2r)
        z = jnp.dot(a_cat, y_c, preferred_element_type=jnp.float32)      # (4r, 2r)
        # z = [[Ar@Yr, Ar@Yi],
        #      [Ai@Yr, Ai@Yi]]
        real = z[:two_r, :r] - z[two_r:, r:]                             # (2r, r)
        imag = z[:two_r, r:] + z[two_r:, :r]                             # (2r, r)
        o_ref[0, c] = jnp.concatenate([real, imag], axis=-1)             # (2r, 2r)


def _dft_matrices(H, W, r):
    # Rows of the H-point DFT we need: [0..r-1] and [H-r..H-1]; fuse re/im
    # along rows -> A_cat (4r, H).
    rows = np.concatenate([np.arange(r), np.arange(H - r, H)])           # (2r,)
    m = np.arange(H)
    ang_a = -2.0 * np.pi * np.outer(rows, m) / H                         # (2r, H)
    a_cat = np.concatenate([np.cos(ang_a), np.sin(ang_a)], axis=0)       # (4r, H)

    # Columns of the W-point DFT we need: [0..r-1]; fuse re/im along cols
    # -> B_cat (W, 2r).
    cols = np.arange(r)
    n = np.arange(W)
    ang_b = -2.0 * np.pi * np.outer(n, cols) / W                         # (W, r)
    b_cat = np.concatenate([np.cos(ang_b), np.sin(ang_b)], axis=1)       # (W, 2r)

    return (jnp.asarray(a_cat, dtype=jnp.float32),
            jnp.asarray(b_cat, dtype=jnp.float32))


def low_pass_filter(x, r):
    """x: (B, C, H, W) float32 with C >= 3. Returns complex64 (B, 3, 2r, r)."""
    B, C, H, W = x.shape
    assert C >= 3, "module hard-codes 3 channels"

    # Stack the 3 channels along rows in the wrapper (free XLA reshape) so the
    # kernel sees a single (3H, W) slab and stage 1 is one matmul per batch.
    x3 = x[:, :3].astype(jnp.float32).reshape(B, 3 * H, W)
    a_cat, b_cat = _dft_matrices(H, W, r)

    packed = pl.pallas_call(
        _lowpass_kernel,
        out_shape=jax.ShapeDtypeStruct((B, 3, 2 * r, 2 * r), jnp.float32),
        grid_spec=pltpu.PrefetchScalarGridSpec(
            num_scalar_prefetch=0,
            grid=(B,),
            in_specs=[
                pl.BlockSpec((1, 3 * H, W), lambda b: (b, 0, 0)),
                pl.BlockSpec((4 * r, H), lambda b: (0, 0)),   # constant across grid
                pl.BlockSpec((W, 2 * r), lambda b: (0, 0)),   # constant across grid
            ],
            out_specs=pl.BlockSpec((1, 3, 2 * r, 2 * r), lambda b: (b, 0, 0, 0)),
        ),
        compiler_params=pltpu.CompilerParams(
            dimension_semantics=("parallel",)),
    )(x3, a_cat, b_cat)

    # Split the lane-packed [real | imag] output into complex64 in the wrapper
    # (Pallas TPU kernels do not emit complex dtypes).
    real = packed[..., :r]
    imag = packed[..., r:]
    return jax.lax.complex(real, imag)


if __name__ == "__main__":
    r = 4
    B, C, H, W = 2, 3, 16, 16
    key = jax.random.PRNGKey(0)
    x = jax.random.normal(key, (B, C, H, W), dtype=jnp.float32)

    out = low_pass_filter(x, r)
    out = jax.block_until_ready(out)

    # Reference check against jnp.fft.fft2 (same semantics as torch.fft.fft2).
    f = jnp.fft.fft2(x)                                    # (B, C, H, W) complex
    ref = jnp.zeros((B, 3, 2 * r, r), dtype=jnp.complex64)
    ref = ref.at[:, :, :r, :].set(f[:, :3, :r, :r])
    ref = ref.at[:, :, -r:, :].set(f[:, :3, -r:, :r])

    assert out.shape == (B, 3, 2 * r, r) and out.dtype == jnp.complex64
    np.testing.assert_allclose(np.asarray(out), np.asarray(ref),
                               rtol=2e-4, atol=2e-4)
    print("KERNEL_OK")
</pallas_src>

<mosaic_0001>
module attributes {stable_mosaic.version = 11 : i64} {
  func.func @_lowpass_kernel(%arg0: i32, %arg1: memref<1x48x16xf32, #tpu.memory_space<vmem>>, %arg2: memref<16x16xf32, #tpu.memory_space<vmem>>, %arg3: memref<16x8xf32, #tpu.memory_space<vmem>>, %arg4: memref<1x3x8x8xf32, #tpu.memory_space<vmem>>) attributes {dimension_semantics = [#tpu.dimension_semantics<parallel>], iteration_bounds = array<i64: 2>, scalar_prefetch = 0 : i64, scratch_operands = 0 : i64, tpu.core_type = #tpu.core_type<tc>, window_params = [{transform_indices = @transform_0, window_bounds = array<i64: 1, 48, 16>}, {pipeline_mode = #tpu.pipeline_mode<synchronous>, transform_indices = @transform_1, window_bounds = array<i64: 16, 16>}, {pipeline_mode = #tpu.pipeline_mode<synchronous>, transform_indices = @transform_2, window_bounds = array<i64: 16, 8>}, {transform_indices = @transform_3, window_bounds = array<i64: 1, 3, 8, 8>}]} {
    %c0 = arith.constant 0 : index
    %c0_0 = arith.constant 0 : index
    %0 = vector.load %arg2[%c0, %c0_0] : memref<16x16xf32, #tpu.memory_space<vmem>>, vector<16x16xf32>
    %c0_1 = arith.constant 0 : index
    %c0_2 = arith.constant 0 : index
    %1 = vector.load %arg3[%c0_1, %c0_2] : memref<16x8xf32, #tpu.memory_space<vmem>>, vector<16x8xf32>
    %c0_3 = arith.constant 0 : index
    %c0_4 = arith.constant 0 : index
    %c0_5 = arith.constant 0 : index
    %2 = vector.load %arg1[%c0_3, %c0_4, %c0_5] : memref<1x48x16xf32, #tpu.memory_space<vmem>>, vector<1x48x16xf32>
    %3 = vector.shape_cast %2 : vector<1x48x16xf32> to vector<48x16xf32>
    %cst = arith.constant dense<0.000000e+00> : vector<48x8xf32>
    %4 = tpu.matmul %3, %1, %cst {dimension_numbers = #tpu.dot_dimension_numbers<[1], [0], [0], [1], [0, 0, 1, 1], [], []>} : vector<48x16xf32>, vector<16x8xf32>, vector<48x8xf32> -> vector<48x8xf32>
    %5 = vector.extract_strided_slice %4 {offsets = [0, 0], sizes = [16, 8], strides = [1, 1]} : vector<48x8xf32> to vector<16x8xf32>
    %cst_6 = arith.constant dense<0.000000e+00> : vector<16x8xf32>
    %6 = tpu.matmul %0, %5, %cst_6 {dimension_numbers = #tpu.dot_dimension_numbers<[1], [0], [0], [1], [0, 0, 1, 1], [], []>} : vector<16x16xf32>, vector<16x8xf32>, vector<16x8xf32> -> vector<16x8xf32>
    %7 = vector.extract_strided_slice %6 {offsets = [0, 0], sizes = [8, 4], strides = [1, 1]} : vector<16x8xf32> to vector<8x4xf32>
    %8 = vector.extract_strided_slice %6 {offsets = [8, 4], sizes = [8, 4], strides = [1, 1]} : vector<16x8xf32> to vector<8x4xf32>
    %9 = arith.subf %7, %8 : vector<8x4xf32>
    %10 = vector.extract_strided_slice %6 {offsets = [0, 4], sizes = [8, 4], strides = [1, 1]} : vector<16x8xf32> to vector<8x4xf32>
    %11 = vector.extract_strided_slice %6 {offsets = [8, 0], sizes = [8, 4], strides = [1, 1]} : vector<16x8xf32> to vector<8x4xf32>
    %12 = arith.addf %10, %11 : vector<8x4xf32>
    %13 = tpu.concatenate %9, %12 in 1 : vector<8x4xf32>, vector<8x4xf32> -> vector<8x8xf32>
    %c0_7 = arith.constant 0 : index
    %c0_8 = arith.constant 0 : index
    %c0_9 = arith.constant 0 : index
    %c0_10 = arith.constant 0 : index
    %14 = vector.load %arg4[%c0_7, %c0_8, %c0_9, %c0_10] : memref<1x3x8x8xf32, #tpu.memory_space<vmem>>, vector<1x1x8x8xf32>
    %15 = vector.shape_cast %14 : vector<1x1x8x8xf32> to vector<8x8xf32>
    %16 = vector.shape_cast %13 : vector<8x8xf32> to vector<1x1x8x8xf32>
    tpu.vector_store %arg4[%c0_7, %c0_8, %c0_9, %c0_10], %16 {strides = array<i32>} : memref<1x3x8x8xf32, #tpu.memory_space<vmem>>, vector<1x1x8x8xf32>,
    %17 = vector.extract_strided_slice %4 {offsets = [16, 0], sizes = [16, 8], strides = [1, 1]} : vector<48x8xf32> to vector<16x8xf32>
    %cst_11 = arith.constant dense<0.000000e+00> : vector<16x8xf32>
    %18 = tpu.matmul %0, %17, %cst_11 {dimension_numbers = #tpu.dot_dimension_numbers<[1], [0], [0], [1], [0, 0, 1, 1], [], []>} : vector<16x16xf32>, vector<16x8xf32>, vector<16x8xf32> -> vector<16x8xf32>
    %19 = vector.extract_strided_slice %18 {offsets = [0, 0], sizes = [8, 4], strides = [1, 1]} : vector<16x8xf32> to vector<8x4xf32>
    %20 = vector.extract_strided_slice %18 {offsets = [8, 4], sizes = [8, 4], strides = [1, 1]} : vector<16x8xf32> to vector<8x4xf32>
    %21 = arith.subf %19, %20 : vector<8x4xf32>
    %22 = vector.extract_strided_slice %18 {offsets = [0, 4], sizes = [8, 4], strides = [1, 1]} : vector<16x8xf32> to vector<8x4xf32>
    %23 = vector.extract_strided_slice %18 {offsets = [8, 0], sizes = [8, 4], strides = [1, 1]} : vector<16x8xf32> to vector<8x4xf32>
    %24 = arith.addf %22, %23 : vector<8x4xf32>
    %25 = tpu.concatenate %21, %24 in 1 : vector<8x4xf32>, vector<8x4xf32> -> vector<8x8xf32>
    %c0_12 = arith.constant 0 : index
    %c1 = arith.constant 1 : index
    %c0_13 = arith.constant 0 : index
    %c0_14 = arith.constant 0 : index
    %26 = vector.load %arg4[%c0_12, %c1, %c0_13, %c0_14] : memref<1x3x8x8xf32, #tpu.memory_space<vmem>>, vector<1x1x8x8xf32>
    %27 = vector.shape_cast %26 : vector<1x1x8x8xf32> to vector<8x8xf32>
    %28 = vector.shape_cast %25 : vector<8x8xf32> to vector<1x1x8x8xf32>
    tpu.vector_store %arg4[%c0_12, %c1, %c0_13, %c0_14], %28 {strides = array<i32>} : memref<1x3x8x8xf32, #tpu.memory_space<vmem>>, vector<1x1x8x8xf32>,
    %29 = vector.extract_strided_slice %4 {offsets = [32, 0], sizes = [16, 8], strides = [1, 1]} : vector<48x8xf32> to vector<16x8xf32>
    %cst_15 = arith.constant dense<0.000000e+00> : vector<16x8xf32>
    %30 = tpu.matmul %0, %29, %cst_15 {dimension_numbers = #tpu.dot_dimension_numbers<[1], [0], [0], [1], [0, 0, 1, 1], [], []>} : vector<16x16xf32>, vector<16x8xf32>, vector<16x8xf32> -> vector<16x8xf32>
    %31 = vector.extract_strided_slice %30 {offsets = [0, 0], sizes = [8, 4], strides = [1, 1]} : vector<16x8xf32> to vector<8x4xf32>
    %32 = vector.extract_strided_slice %30 {offsets = [8, 4], sizes = [8, 4], strides = [1, 1]} : vector<16x8xf32> to vector<8x4xf32>
    %33 = arith.subf %31, %32 : vector<8x4xf32>
    %34 = vector.extract_strided_slice %30 {offsets = [0, 4], sizes = [8, 4], strides = [1, 1]} : vector<16x8xf32> to vector<8x4xf32>
    %35 = vector.extract_strided_slice %30 {offsets = [8, 0], sizes = [8, 4], strides = [1, 1]} : vector<16x8xf32> to vector<8x4xf32>
    %36 = arith.addf %34, %35 : vector<8x4xf32>
    %37 = tpu.concatenate %33, %36 in 1 : vector<8x4xf32>, vector<8x4xf32> -> vector<8x8xf32>
    %c0_16 = arith.constant 0 : index
    %c2 = arith.constant 2 : index
    %c0_17 = arith.constant 0 : index
    %c0_18 = arith.constant 0 : index
    %38 = vector.load %arg4[%c0_16, %c2, %c0_17, %c0_18] : memref<1x3x8x8xf32, #tpu.memory_space<vmem>>, vector<1x1x8x8xf32>
    %39 = vector.shape_cast %38 : vector<1x1x8x8xf32> to vector<8x8xf32>
    %40 = vector.shape_cast %37 : vector<8x8xf32> to vector<1x1x8x8xf32>
    tpu.vector_store %arg4[%c0_16, %c2, %c0_17, %c0_18], %40 {strides = array<i32>} : memref<1x3x8x8xf32, #tpu.memory_space<vmem>>, vector<1x1x8x8xf32>,
    return
  }
  func.func @transform_0(%arg0: i32) -> (i32, i32, i32) {
    %c0_i32 = arith.constant 0 : i32
    %c0_i32_0 = arith.constant 0 : i32
    %c0_i32_1 = arith.constant 0 : i32
    return %arg0, %c0_i32, %c0_i32_0 : i32, i32, i32
  }
  func.func @transform_1(%arg0: i32) -> (i32, i32) {
    %c0_i32 = arith.constant 0 : i32
    %c0_i32_0 = arith.constant 0 : i32
    %c0_i32_1 = arith.constant 0 : i32
    return %c0_i32, %c0_i32_0 : i32, i32
  }
  func.func @transform_2(%arg0: i32) -> (i32, i32) {
    %c0_i32 = arith.constant 0 : i32
    %c0_i32_0 = arith.constant 0 : i32
    %c0_i32_1 = arith.constant 0 : i32
    return %c0_i32, %c0_i32_0 : i32, i32
  }
  func.func @transform_3(%arg0: i32) -> (i32, i32, i32, i32) {
    %c0_i32 = arith.constant 0 : i32
    %c0_i32_0 = arith.constant 0 : i32
    %c0_i32_1 = arith.constant 0 : i32
    %c0_i32_2 = arith.constant 0 : i32
    return %arg0, %c0_i32, %c0_i32_0, %c0_i32_1 : i32, i32, i32, i32
  }
}

</mosaic_0001>

<bundles_post_ra>
// kernel: tpu_custom_call.1
= control target key start
LH: loop header
LB: loop body
LE: loop exit
PB: predicated region body
PF: predicated region fallthrough
CT: control target
= control target key end

     0   :  { %8 = vsyncpa [#allocation3], 0  ;;  %s700_s0 = inlined_call_operand.vmem [shape: f32[2,48,16], index: 0, kind: input, shape index: {}]   ;;  %s701_s1 = inlined_call_operand.vmem [shape: f32[16,16], index: 1, kind: input, shape index: {}]   ;;  %s702_s2 = inlined_call_operand.vmem [shape: f32[16,8], index: 2, kind: input, shape index: {}]   ;;  %s703_s3 = inlined_call_operand.hbm [shape: f32[2,3,8,8], index: 3, kind: output, shape index: {}]  }
   0x1   :  { %10 = vsyncpa [#allocation3 + $0x1], 0  ;;  %s585_s12 = smov 0   ;;  %s587_s13 = smov 0  }
   0x2   :  { %s589_s14 = smov 0   ;;  %s591_s15 = smov 0  }
   0x3 LB: > { %s606_s16 = sadd.s32 4294967295, %s559_s15   ;;  %s423_s17 = sadd.s32 4294967294, %s559_s15   ;;  %s559_s15 = sphi %s591_s15, %s709_s15   ;;  %s555_s14 = sphi %s589_s14, %s708_s14   ;;  %s551_s13 = sphi %s587_s13, %s707_s13   ;;  %s547_s12 = sphi %s585_s12, %s706_s12  }
   0x4   : > { %s610_s18 = sadd.s32 1, %s559_s15   ;;  %s91_s19 = sadd.s32 1, %s555_s14 }
   0x5   : > { %s88_s20 = ssub.s32 %s559_s15, %s610_s18  ;;  %p101_p0 = scmp.ne.s32.totalorder %s555_s14, %s551_s13 }
   0x6   : > { %p89_p1 = scmp.eq.s32.totalorder %s88_s20, 0  ;;  %p102_p2 = scmp.eq.s32.totalorder %s606_s16, 1 }
   0x7   : > { %p107_p3 = scmp.ne.s32.totalorder %s551_s13, %s547_s12  ;;  %p108_p4 = scmp.eq.s32.totalorder %s423_s17, 1 }
   0x8   : > { %s621_s21 = scalar_select %p89_p1, %s555_s14, %s91_s19  }
   0x9   : > { %p623_p5 = por %p102_p2, %p101_p0  ;;  %p627_p6 = por %p108_p4, %p107_p3 }
   0xa   : > { %p426_p7 = scmp.ge.s32.totalorder %s559_s15, 1  ;;  %p140_p8 = scmp.lt.s32.totalorder %s559_s15, 3 }
   0xc   : > { %p141_p9 = pnand %p426_p7, %p140_p8 }
   0xd   : > { %p164_p10 = scmp.lt.s32.totalorder (!%p141_p9), %s606_s16, 1  ;;  %s561_s10 = smov (!%p141_p9), 124  }
   0xe   : > { %144 = sbr.rel (%p141_p9) target bundleno = 438 (0x1b6), region = 32  ;;  %s562_s11 = smov (!%p141_p9), 4  }
   0xf   : > { %s161_s17 = sand.u32 (!%p141_p9), 1, %s551_s13   ;;  %s453_s24 = smul.u32 (!%p141_p9), 24, %s606_s16 }
  0x10   : > { %s451_s19 = smul.u32 (!%p141_p9), 24, %s161_s17  ;;  %s517_s7 = scalar_lea.hbm (!%p141_p9), %s703_s3, 48 }
  0x11   : > { %s357_s27 = scalar_lea.hbm (!%p141_p9), %s703_s3, %s453_s24 }
  0x12   : > { %s163_s20 = scalar_lea.vmem (!%p141_p9), [#allocation2], %s451_s19 }
  0x13   : > { %v172_v0 = vld [vmem:[%s702_s2 + $0x8] sm:$0xff]  ;;  %v171_v1 = vld [vmem:[%s702_s2] sm:$0xff]  ;;  %s165_s28 = scalar_select %p164_p10, %s606_s16, 1  ;;  %vm179_vm0 = vcmask 130048   ;;  %vm271_vm1 = vcmask 31744   ;;  %vm273_vm2 = vcmask 64512  }
  0x14   : > { %212 = vmatpush.msra.mxu0 %v172_v0  ;;  %447 = vmatpush.msra.mxu3 %v172_v0  ;;  %v169_v12 = vld [vmem:[%s701_s1] sm:$0xff]  ;;  %v170_v14 = vld [vmem:[%s701_s1 + $0x8] sm:$0xff]  ;;  %s346_s16 = scalar_lea.sflag [#allocation3], %s161_s17 }
  0x15   : > { %446 = vmatpush.msra.mxu2 %v172_v0  ;;  %445 = vmatpush.msra.mxu1 %v172_v0  ;;  %s452_s29 = smul.u32 48, %s165_s28  ;;  %s358_s28 = sshll.u32 %s163_s20, 4  ;;  %s359_s28 = int_to_ptr.vmem [resolvable:$true] %s358_s28 }
  0x16   : > { %213 = vmatpush.msra.mxu0 %v171_v1  ;;  %450 = vmatpush.msra.mxu3 %v171_v1 }
  0x17   : > { %449 = vmatpush.msra.mxu2 %v171_v1  ;;  %448 = vmatpush.msra.mxu1 %v171_v1  ;;  %s168_s5 = scalar_lea.vmem %s700_s0, %s452_s29  ;;  %s360_s29 = sshll.u32 %s357_s27, 4  ;;  %s361_s29 = int_to_ptr.hbm [resolvable:$true] %s360_s29 }
  0x18   : > { %v173_v2 = vld [vmem:[%s168_s5] sm:$0xff]  ;;  %v178_v3 = vld [vmem:[%s168_s5 + $0x28] sm:$0xff]  ;;  %v176_v5 = vld [vmem:[%s168_s5 + $0x18] sm:$0xff]  ;;  %s511_s30 = sshra.s32 %s361_s29, 4  ;;  %s512_s30 = int_to_ptr.hbm [resolvable:$true] %s511_s30 }
  0x19   : > { %v177_v4 = vld [vmem:[%s168_s5 + $0x20] sm:$0xff]  ;;  %428 = vmatmul.msk.f32.vlgmr.msra.gmra.mxu0 %vm179_vm0, %v173_v2  ;;  %433 = vmatmul.msk.f32.vlgmr.msra.gmra.mxu3 %vm179_vm0, %v178_v3  ;;  %v174_v6 = vld [vmem:[%s168_s5 + $0x8] sm:$0xff]  ;;  %v175_v7 = vld [vmem:[%s168_s5 + $0x10] sm:$0xff]  ;;  %s513_s4 = scalar_lea.hbm %s512_s30, 24  ;;  %p518_p0 = scmp.lt.s32.totalorder %s512_s30, %s703_s3 }
  0x1a   : > { %432 = vmatmul.msk.f32.vlgmr.msra.gmra.mxu2 %vm179_vm0, %v177_v4  ;;  %431 = vmatmul.msk.f32.vlgmr.msra.gmra.mxu1 %vm179_vm0, %v176_v5  ;;  %p514_p11 = scmp.ne.s32.totalorder %s512_s30, %s513_s4  ;;  %p519_p1 = scmp.lt.s32.totalorder %s517_s7, %s513_s4 }
  0x1c   : > { %p515_p12 = pnand %p514_p11, %p623_p5  ;;  %p520_p2 = por %p519_p1, %p518_p0 }
  0x1e   : > { %p516_p13 = pneg %p515_p12 }
  0x20   : > { %p521_p3 = pnand %p520_p2, %p516_p13 }
  0x21   : > { %429 = vmatmul.msk.f32.gmra.mxu0 %vm179_vm0, %v174_v6 }
  0x29   : > { %430 = vmatmul.msk.f32.gmra.mxu0 %vm179_vm0, %v175_v7 }
  0x96   : > { %v215_v8 = vpop.f32.mrf.mxu0 }
  0x97   : > { %v224_v9 = vpop.f32.mrf.mxu1 }
  0x98   : > { %289 = vmatpush.msrb.mxu2 %v224_v9 }
  0x9c   : > { %v230_v10 = vpop.f32.mrf.mxu3 }
  0x9d   : > { %324 = vmatpush.msrb.mxu3 %v230_v10  ;;  %v227_v11 = vpop.f32.mrf.mxu2 }
  0x9e   : > { %v218_v13 = vpop.f32.mrf.mxu0 }
  0x9f   : > { %253 = vmatpush.msrb.mxu1 %v218_v13  ;;  %325 = vmatpush.msrb.mxu3 %v227_v11 }
  0xa0   : > { %439 = vmatmul.msk.f32.vlgmr.msrb.gmra.mxu3 %vm179_vm0, %v169_v12 }
  0xa1   : > { %254 = vmatpush.msrb.mxu1 %v215_v8 }
  0xa2   : > { %434 = vmatmul.msk.f32.vlgmr.msrb.gmra.mxu1 %vm179_vm0, %v169_v12 }
  0xa6   : > { %v221_v15 = vpop.f32.mrf.mxu0 }
  0xa7   : > { %290 = vmatpush.msrb.mxu2 %v221_v15 }
  0xa8   : > { %436 = vmatmul.msk.f32.vlgmr.msrb.gmra.mxu2 %vm179_vm0, %v169_v12  ;;  %440 = vmatmul.msk.f32.gmra.mxu3 %vm179_vm0, %v170_v14 }
  0xaa   : > { %435 = vmatmul.msk.f32.gmra.mxu1 %vm179_vm0, %v170_v14 }
  0xb0   : > { %437 = vmatmul.msk.f32.gmra.mxu2 %vm179_vm0, %v170_v14 }
 0x11f   : > { %v256_v16 = vpop.f32.mrf.mxu1 }
 0x123   : > { %v327_v17 = vpop.f32.mrf.mxu3 }
 0x127   : > { %v259_v18 = vpop.f32.mrf.mxu1 }
 0x128   : > { %263 = vrot.lane.b32.xlu0 %v259_v18, %s561_s10 }
 0x12b   : > { %v292_v19 = vpop.f32.mrf.mxu2  ;;  %v330_v20 = vpop.f32.mrf.mxu3 }
 0x12c   : > { %334 = vrot.lane.b32.xlu2 %v330_v20, %s561_s10 }
 0x130   : > { %267 = vrot.lane.b32.xlu0 %v259_v18, %s562_s11 }
 0x133   : > { %v295_v21 = vpop.f32.mrf.mxu2 }
 0x134   : > { %338 = vrot.lane.b32.xlu2 %v330_v20, %s562_s11  ;;  %299 = vrot.lane.b32.xlu1 %v295_v21, %s561_s10 }
 0x13c   : > { %303 = vrot.lane.b32.xlu1 %v295_v21, %s562_s11 }
 0x186   : > { %v335_v22 = vpop.permute.xlu2 %334 }
 0x187   : > { %v337_v24 = vsub.f32 %v327_v17, %v335_v22 }
 0x18e   : > { %v339_v23 = vpop.permute.xlu2 %338 }
 0x18f   : > { %v341_v25 = vadd.f32 %v339_v23, %v327_v17 }
 0x191   : > { %v342_v26 = vsel %vm271_vm1, %v337_v24, %v341_v25 }
 0x192   : > { %441 = vst.msk [vmem:[%s163_s20 + $0x10] sm:$0xff] %vm273_vm2, %v342_v26 }
 0x19a   : > { %v264_v27 = vpop.permute.xlu0 %263 }
 0x19b   : > { %v266_v29 = vsub.f32 %v256_v16, %v264_v27 }
 0x1a2   : > { %v268_v28 = vpop.permute.xlu0 %267 }
 0x1a3   : > { %v270_v30 = vadd.f32 %v268_v28, %v256_v16 }
 0x1a5   : > { %v272_v31 = vsel %vm271_vm1, %v266_v29, %v270_v30 }
 0x1a6   : > { %274 = vst.msk [vmem:[%s163_s20] sm:$0xff] %vm273_vm2, %v272_v31  ;;  %v300_v32 = vpop.permute.xlu1 %299 }
 0x1a7   : > { %v302_v34 = vsub.f32 %v292_v19, %v300_v32 }
 0x1ae   : > { %v304_v33 = vpop.permute.xlu1 %303 }
 0x1af   : > { %v306_v35 = vadd.f32 %v304_v33, %v292_v19 }
 0x1b1   : > { %v307_v36 = vsel %vm271_vm1, %v302_v34, %v306_v35 }
 0x1b2   : > { %438 = vst.msk [vmem:[%s163_s20 + $0x8] sm:$0xff] %vm273_vm2, %v307_v36 }
 0x1b3   : > { %524 = shalt.err (!%p521_p3)
}
 0x1b4   : > { %s563_s10 = smov 128   ;;  %s564_s11 = smov 8  }
 0x1b5   : > { %454 = dma.vmem_to_hbm [thread:$0]  (%p623_p5), %s359_s28, 384, %s361_s29, %s346_s16, %s563_s10, %s563_s10, %s564_s11  }
 0x1b6 PF: > { %p460_p4 = scmp.ge.s32.totalorder %s559_s15, 2  ;;  %s375_s17 = sand.u32 1, %s547_s12  }
 0x1b7   : > { %s376_s19 = scalar_lea.sflag [#allocation3], %s375_s17 }
 0x1b8   : > { %p457_p7 = pnand %p460_p4, %p627_p6 }
 0x1ba   : > { %p458_p8 = pneg %p457_p7 }
 0x1bc   : > { %542 = dma.done.wait (%p458_p8), %s376_s19, 384  }
 0x1bd   : > { %544 = vsyncadd (%p458_p8), %s376_s19, 4294966912  ;;  %p13_p9 = scmp.ge.s32.totalorder %s610_s18, 4   ;;  %s706_s12 = smov %s551_s13 }
 0x1be   : > { %s707_s13 = smov %s555_s14  ;;  %s708_s14 = smov %s621_s21 }
 0x1bf   : > { %s709_s15 = smov %s610_s18  ;;  %15 = sbr.rel (!%p13_p9) target bundleno = 3 (0x3), region = 69 }
 0x1c4   :  { %382 = vsyncpa [#allocation3], 1 }
 0x1c5   :  { %384 = vsyncpa [#allocation3 + $0x1], 1 }

</bundles_post_ra>
